<compile_context>
chip_gen: v5e
topology: v5e:2x2
jax: 0.10.0
libtpu: 0.0.40
codegen_flags: <defaults>
</compile_context>

<pallas_src>
import numpy as np
from numpy.polynomial import polynomial as npoly

import jax
import jax.numpy as jnp
from jax.experimental import pallas as pl
from jax.experimental.pallas import tpu as pltpu

# ---- spline configuration (pykan defaults) --------------------------------
GRID_SIZE = 5            # number of grid intervals G
SPLINE_ORDER = 3         # k
GRID_RANGE = (-1.0, 1.0)
_H = (GRID_RANGE[1] - GRID_RANGE[0]) / GRID_SIZE
INV_H = 1.0 / _H
# extended knot vector: G + 2k + 1 knots
KNOTS = tuple(
    GRID_RANGE[0] - SPLINE_ORDER * _H + i * _H
    for i in range(GRID_SIZE + 2 * SPLINE_ORDER + 1)
)
NUM_BASIS = len(KNOTS) - 1 - SPLINE_ORDER   # = G + k = 8
N_INT = len(KNOTS) - 1                      # = 11 knot intervals
POLY_STRIDE = N_INT * (SPLINE_ORDER + 1)    # 44 scalars per channel


# ---- host-side exact piecewise-polynomial table ----------------------------
def _build_local_poly_table():
    """BASIS_POLY_LOCAL[i, j, s]: coefficient of u**s of basis B_j restricted to
    knot interval i, in local coordinates u = x - KNOTS[i] (exact float64
    symbolic Cox-de Boor + Taylor shift)."""
    t = np.array(KNOTS, dtype=np.float64)
    n_knots = len(t)
    n_int = n_knots - 1
    k = SPLINE_ORDER
    polys = [[np.zeros(1) for _ in range(n_int)] for _ in range(n_int)]
    for j in range(n_int):
        polys[j][j] = np.array([1.0])          # order-0 indicator of interval j
    for d in range(1, k + 1):
        nxt = []
        for j in range(n_knots - 1 - d):
            dl = t[j + d] - t[j]
            dr = t[j + d + 1] - t[j + 1]
            row = []
            for i in range(n_int):
                left = npoly.polymul(np.array([-t[j] / dl, 1.0 / dl]), polys[j][i])
                right = npoly.polymul(
                    np.array([t[j + d + 1] / dr, -1.0 / dr]), polys[j + 1][i])
                row.append(npoly.polyadd(left, right))
            nxt.append(row)
        polys = nxt
    table = np.zeros((n_int, NUM_BASIS, k + 1), dtype=np.float64)
    for j in range(NUM_BASIS):
        for i in range(n_int):
            p = np.zeros(k + 1)
            pj = polys[j][i]
            p[: len(pj)] = pj
            # Taylor shift: q(u) = p(t_i + u)
            shift = np.array([t[i], 1.0])
            q = np.array([p[k]])
            for s in range(k - 1, -1, -1):
                q = npoly.polyadd(npoly.polymul(q, shift), np.array([p[s]]))
            table[i, j, : len(q)] = q
    return table


BASIS_POLY_LOCAL = _build_local_poly_table()    # (11, 8, 4) float64


# ---- kernel -----------------------------------------------------------------
def kan_kernel(poly_ref, sb_ref, x_ref, o_ref):
    # poly_ref: SMEM (C*44,)  per-channel/per-interval cubic coeffs (local
    #           coordinates, scale_sp folded in)
    # sb_ref  : SMEM (C*2,)   [scale_base, bias] per channel
    # x_ref   : VMEM (BT, 1, RT, 128) lane-dense slab of one channel
    c = pl.program_id(1)
    x = x_ref[...].astype(jnp.float32)

    # --- base branch: SiLU (logistic lowers to a single EUP transcendental) ---
    base = x * jax.nn.sigmoid(x)

    # --- spline branch: interval index + local coord from the uniform grid ---
    s = (x - jnp.float32(KNOTS[0])) * jnp.float32(INV_H)
    idx = jnp.clip(jnp.floor(s), 0.0, jnp.float32(N_INT - 1))
    u = (s - idx) * jnp.float32(_H)

    pbase = c * POLY_STRIDE
    c0 = poly_ref[pbase + 0]
    c1 = poly_ref[pbase + 1]
    c2 = poly_ref[pbase + 2]
    c3 = poly_ref[pbase + 3]
    for i in range(1, N_INT):               # 10 compares + 40 selects, unrolled
        gi = idx >= jnp.float32(i)
        off = pbase + i * (SPLINE_ORDER + 1)
        c0 = jnp.where(gi, poly_ref[off + 0], c0)
        c1 = jnp.where(gi, poly_ref[off + 1], c1)
        c2 = jnp.where(gi, poly_ref[off + 2], c2)
        c3 = jnp.where(gi, poly_ref[off + 3], c3)

    spline = c0 + u * (c1 + u * (c2 + u * c3))
    # outside the extended knot range the spline branch is exactly zero
    # (matches pykan's half-open order-0 basis convention)
    spline = jnp.where(
        (x >= jnp.float32(KNOTS[0])) & (x < jnp.float32(KNOTS[N_INT])),
        spline, jnp.float32(0.0))

    y = sb_ref[2 * c] * base + spline + sb_ref[2 * c + 1]
    o_ref[...] = y.astype(o_ref.dtype)


# ---- wrapper ----------------------------------------------------------------
@jax.jit
def kan_activation(x, coef, scales):
    """x: (B,C,H,W); coef: (C, NUM_BASIS); scales: (C,3)=[scale_base,scale_sp,bias]."""
    B, C, H, W = x.shape
    S = H * W
    itemsize = x.dtype.itemsize

    # per-channel, per-interval cubic table, scale_sp folded in -> (C, 11, 4)
    table = jnp.asarray(BASIS_POLY_LOCAL, dtype=jnp.float32)
    poly = jnp.einsum("cj,ijs->cis", coef.astype(jnp.float32), table)
    poly = poly * scales[:, 1].astype(jnp.float32)[:, None, None]
    poly_flat = poly.reshape(-1)                                       # (C*44,)
    sb_flat = jnp.stack(
        [scales[:, 0], scales[:, 2]], axis=1).astype(jnp.float32).reshape(-1)

    # lane-dense spatial layout: (B,C,H,W) -> (B,C,R,128).
    # Only pad to the next multiple of 128 (guarded, usually elided);
    # ragged spatial blocks are handled by the grid (masked writes).
    R = -(-S // 128)
    S_pad = R * 128
    x_flat = x.reshape(B, C, S)
    if S_pad != S:
        x_flat = jnp.pad(x_flat, ((0, 0), (0, 0), (0, S_pad - S)))
    x4 = x_flat.reshape(B, C, R, 128)

    # tiling: ~1 MiB input slab per grid step; RT multiple of the dtype's
    # minimum sublane count (f32:8, bf16:16, int8:32) or the full extent R.
    min_rt = max(8, 32 // itemsize)
    row_bytes = 128 * itemsize
    TARGET = 1 << 20
    if R * row_bytes <= TARGET:
        RT = R
    else:
        RT = max(min_rt, ((TARGET // row_bytes) // min_rt) * min_rt)
    St = -(-R // RT)
    # batch tile chosen so each DMA segment stays big and slab ~= TARGET
    BT = max(1, min(B, TARGET // (RT * row_bytes)))
    Bt = -(-B // BT)

    # megacore guard (v7x has 2 TensorCores): offer at least 2 blocks.
    if Bt * C * St < 2:
        if R > min_rt:
            RT = min_rt * (-(-(-(-R // 2)) // min_rt))
            St = -(-R // RT)
        elif B >= 2:
            BT = -(-B // 2)
            Bt = -(-B // BT)

    n_elems = B * C * R * 128
    cost = pl.CostEstimate(
        flops=80 * n_elems,
        transcendentals=n_elems,
        bytes_accessed=2 * n_elems * itemsize
        + int(poly_flat.size) * 4 + int(sb_flat.size) * 4)

    out4 = pl.pallas_call(
        kan_kernel,
        out_shape=jax.ShapeDtypeStruct((B, C, R, 128), x.dtype),
        grid=(Bt, C, St),
        in_specs=[
            pl.BlockSpec(memory_space=pltpu.MemorySpace.SMEM),   # poly_flat
            pl.BlockSpec(memory_space=pltpu.MemorySpace.SMEM),   # sb_flat
            pl.BlockSpec((BT, 1, RT, 128), lambda b, c, s: (b, c, s, 0)),
        ],
        out_specs=pl.BlockSpec((BT, 1, RT, 128), lambda b, c, s: (b, c, s, 0)),
        compiler_params=pltpu.CompilerParams(
            dimension_semantics=("parallel", "parallel", "parallel"),
            vmem_limit_bytes=32 * 1024 * 1024),
        cost_estimate=cost,
    )(poly_flat, sb_flat, x4)

    if S_pad != S:
        out = out4.reshape(B, C, S_pad)[:, :, :S].reshape(B, C, H, W)
    else:
        out = out4.reshape(B, C, H, W)
    return out


# ---- pure-JAX reference for verification (original Cox-de Boor form) --------
def _bspline_bases(x):
    t = KNOTS
    k = SPLINE_ORDER
    bases = [
        jnp.where((x >= t[j]) & (x < t[j + 1]), 1.0, 0.0).astype(jnp.float32)
        for j in range(len(t) - 1)
    ]
    for d in range(1, k + 1):
        new_bases = []
        for j in range(len(t) - 1 - d):
            left = (x - t[j]) / (t[j + d] - t[j]) * bases[j]
            right = (t[j + d + 1] - x) / (t[j + d + 1] - t[j + 1]) * bases[j + 1]
            new_bases.append(left + right)
        bases = new_bases
    return bases


def kan_reference(x, coef, scales):
    xf = x.astype(jnp.float32)
    base = xf * jax.nn.sigmoid(xf)
    bases = jnp.stack(_bspline_bases(xf), axis=-1)          # (B, C, H, W, NB)
    spline = jnp.einsum("bchwj,cj->bchw", bases, coef)
    sb = scales[:, 0][None, :, None, None]
    sp = scales[:, 1][None, :, None, None]
    bi = scales[:, 2][None, :, None, None]
    return (sb * base + sp * spline + bi).astype(x.dtype)


if __name__ == "__main__":
    key = jax.random.PRNGKey(0)
    B, C, H, W = 2, 4, 16, 16

    k_x, k_coef = jax.random.split(key)
    x = jax.random.normal(k_x, (B, C, H, W), dtype=jnp.float32)

    # Deterministic synthetic parameters (mirrors pykan init style):
    #   coef: small random spline coefficients; scale_base=1, scale_sp=1, bias=0.
    coef = 0.1 * jax.random.normal(k_coef, (C, NUM_BASIS), dtype=jnp.float32)
    scales = jnp.concatenate(
        [jnp.ones((C, 1), jnp.float32),    # scale_base
         jnp.ones((C, 1), jnp.float32),    # scale_sp
         jnp.zeros((C, 1), jnp.float32)],  # bias
        axis=1)

    out = kan_activation(x, coef, scales)
    jax.block_until_ready(out)

    ref = kan_reference(x, coef, scales)
    assert out.shape == (B, C, H, W)
    assert jnp.allclose(out, ref, atol=2e-5, rtol=2e-5), "mismatch vs reference"

    print("KERNEL_OK")
</pallas_src>

<mosaic_0001>
module attributes {stable_mosaic.version = 11 : i64} {
  func.func @kan_kernel(%arg0: i32, %arg1: i32, %arg2: i32, %arg3: memref<176xf32, #tpu.memory_space<smem>>, %arg4: memref<8xf32, #tpu.memory_space<smem>>, %arg5: memref<2x1x2x128xf32, #tpu.memory_space<vmem>>, %arg6: memref<2x1x2x128xf32, #tpu.memory_space<vmem>>) attributes {dimension_semantics = [#tpu.dimension_semantics<parallel>, #tpu.dimension_semantics<parallel>, #tpu.dimension_semantics<parallel>], iteration_bounds = array<i64: 1, 4, 1>, scalar_prefetch = 0 : i64, scratch_operands = 0 : i64, tpu.core_type = #tpu.core_type<tc>, window_params = [{transform_indices = @transform_0, window_bounds = array<i64: 176>}, {transform_indices = @transform_1, window_bounds = array<i64: 8>}, {transform_indices = @transform_2, window_bounds = array<i64: 2, 1, 2, 128>}, {transform_indices = @transform_3, window_bounds = array<i64: 2, 1, 2, 128>}]} {
    %c0 = arith.constant 0 : index
    %c0_0 = arith.constant 0 : index
    %c0_1 = arith.constant 0 : index
    %c0_2 = arith.constant 0 : index
    %0 = vector.load %arg5[%c0, %c0_0, %c0_1, %c0_2] : memref<2x1x2x128xf32, #tpu.memory_space<vmem>>, vector<2x1x2x128xf32>
    %1 = arith.negf %0 : vector<2x1x2x128xf32>
    %2 = math.exp %1 : vector<2x1x2x128xf32>
    %cst = arith.constant 1.000000e+00 : f32
    %3 = vector.broadcast %cst : f32 to vector<2x1x2x128xf32>
    %4 = arith.addf %3, %2 : vector<2x1x2x128xf32>
    %5 = arith.divf %3, %4 : vector<2x1x2x128xf32>
    %6 = arith.mulf %0, %5 : vector<2x1x2x128xf32>
    %cst_3 = arith.constant -2.200000e+00 : f32
    %7 = vector.broadcast %cst_3 : f32 to vector<2x1x2x128xf32>
    %8 = arith.subf %0, %7 : vector<2x1x2x128xf32>
    %cst_4 = arith.constant 2.500000e+00 : f32
    %9 = vector.broadcast %cst_4 : f32 to vector<2x1x2x128xf32>
    %10 = arith.mulf %8, %9 : vector<2x1x2x128xf32>
    %11 = math.floor %10 : vector<2x1x2x128xf32>
    %cst_5 = arith.constant 0.000000e+00 : f32
    %cst_6 = arith.constant 1.000000e+01 : f32
    %12 = vector.broadcast %cst_5 : f32 to vector<2x1x2x128xf32>
    %13 = arith.maximumf %12, %11 : vector<2x1x2x128xf32>
    %14 = vector.broadcast %cst_6 : f32 to vector<2x1x2x128xf32>
    %15 = arith.minimumf %14, %13 : vector<2x1x2x128xf32>
    %16 = arith.subf %10, %15 : vector<2x1x2x128xf32>
    %cst_7 = arith.constant 4.000000e-01 : f32
    %17 = vector.broadcast %cst_7 : f32 to vector<2x1x2x128xf32>
    %18 = arith.mulf %16, %17 : vector<2x1x2x128xf32>
    %c44_i32 = arith.constant 44 : i32
    %19 = arith.muli %arg1, %c44_i32 : i32
    %c0_i32 = arith.constant 0 : i32
    %20 = arith.addi %19, %c0_i32 : i32
    %21 = arith.index_cast %20 : i32 to index
    %22 = memref.load %arg3[%21] : memref<176xf32, #tpu.memory_space<smem>>
    %c1_i32 = arith.constant 1 : i32
    %23 = arith.addi %19, %c1_i32 : i32
    %24 = arith.index_cast %23 : i32 to index
    %25 = memref.load %arg3[%24] : memref<176xf32, #tpu.memory_space<smem>>
    %c2_i32 = arith.constant 2 : i32
    %26 = arith.addi %19, %c2_i32 : i32
    %27 = arith.index_cast %26 : i32 to index
    %28 = memref.load %arg3[%27] : memref<176xf32, #tpu.memory_space<smem>>
    %c3_i32 = arith.constant 3 : i32
    %29 = arith.addi %19, %c3_i32 : i32
    %30 = arith.index_cast %29 : i32 to index
    %31 = memref.load %arg3[%30] : memref<176xf32, #tpu.memory_space<smem>>
    %cst_8 = arith.constant 1.000000e+00 : f32
    %32 = vector.broadcast %cst_8 : f32 to vector<2x1x2x128xf32>
    %33 = arith.cmpf oge, %15, %32 : vector<2x1x2x128xf32>
    %c4_i32 = arith.constant 4 : i32
    %34 = arith.addi %19, %c4_i32 : i32
    %c0_i32_9 = arith.constant 0 : i32
    %35 = arith.addi %34, %c0_i32_9 : i32
    %36 = arith.index_cast %35 : i32 to index
    %37 = memref.load %arg3[%36] : memref<176xf32, #tpu.memory_space<smem>>
    %38 = vector.broadcast %37 : f32 to vector<2x1x2x128xf32>
    %39 = vector.broadcast %22 : f32 to vector<2x1x2x128xf32>
    %40 = arith.select %33, %38, %39 : vector<2x1x2x128xi1>, vector<2x1x2x128xf32>
    %c1_i32_10 = arith.constant 1 : i32
    %41 = arith.addi %34, %c1_i32_10 : i32
    %42 = arith.index_cast %41 : i32 to index
    %43 = memref.load %arg3[%42] : memref<176xf32, #tpu.memory_space<smem>>
    %44 = vector.broadcast %43 : f32 to vector<2x1x2x128xf32>
    %45 = vector.broadcast %25 : f32 to vector<2x1x2x128xf32>
    %46 = arith.select %33, %44, %45 : vector<2x1x2x128xi1>, vector<2x1x2x128xf32>
    %c2_i32_11 = arith.constant 2 : i32
    %47 = arith.addi %34, %c2_i32_11 : i32
    %48 = arith.index_cast %47 : i32 to index
    %49 = memref.load %arg3[%48] : memref<176xf32, #tpu.memory_space<smem>>
    %50 = vector.broadcast %49 : f32 to vector<2x1x2x128xf32>
    %51 = vector.broadcast %28 : f32 to vector<2x1x2x128xf32>
    %52 = arith.select %33, %50, %51 : vector<2x1x2x128xi1>, vector<2x1x2x128xf32>
    %c3_i32_12 = arith.constant 3 : i32
    %53 = arith.addi %34, %c3_i32_12 : i32
    %54 = arith.index_cast %53 : i32 to index
    %55 = memref.load %arg3[%54] : memref<176xf32, #tpu.memory_space<smem>>
    %56 = vector.broadcast %55 : f32 to vector<2x1x2x128xf32>
    %57 = vector.broadcast %31 : f32 to vector<2x1x2x128xf32>
    %58 = arith.select %33, %56, %57 : vector<2x1x2x128xi1>, vector<2x1x2x128xf32>
    %cst_13 = arith.constant 2.000000e+00 : f32
    %59 = vector.broadcast %cst_13 : f32 to vector<2x1x2x128xf32>
    %60 = arith.cmpf oge, %15, %59 : vector<2x1x2x128xf32>
    %c8_i32 = arith.constant 8 : i32
    %61 = arith.addi %19, %c8_i32 : i32
    %c0_i32_14 = arith.constant 0 : i32
    %62 = arith.addi %61, %c0_i32_14 : i32
    %63 = arith.index_cast %62 : i32 to index
    %64 = memref.load %arg3[%63] : memref<176xf32, #tpu.memory_space<smem>>
    %65 = vector.broadcast %64 : f32 to vector<2x1x2x128xf32>
    %66 = arith.select %60, %65, %40 : vector<2x1x2x128xi1>, vector<2x1x2x128xf32>
    %c1_i32_15 = arith.constant 1 : i32
    %67 = arith.addi %61, %c1_i32_15 : i32
    %68 = arith.index_cast %67 : i32 to index
    %69 = memref.load %arg3[%68] : memref<176xf32, #tpu.memory_space<smem>>
    %70 = vector.broadcast %69 : f32 to vector<2x1x2x128xf32>
    %71 = arith.select %60, %70, %46 : vector<2x1x2x128xi1>, vector<2x1x2x128xf32>
    %c2_i32_16 = arith.constant 2 : i32
    %72 = arith.addi %61, %c2_i32_16 : i32
    %73 = arith.index_cast %72 : i32 to index
    %74 = memref.load %arg3[%73] : memref<176xf32, #tpu.memory_space<smem>>
    %75 = vector.broadcast %74 : f32 to vector<2x1x2x128xf32>
    %76 = arith.select %60, %75, %52 : vector<2x1x2x128xi1>, vector<2x1x2x128xf32>
    %c3_i32_17 = arith.constant 3 : i32
    %77 = arith.addi %61, %c3_i32_17 : i32
    %78 = arith.index_cast %77 : i32 to index
    %79 = memref.load %arg3[%78] : memref<176xf32, #tpu.memory_space<smem>>
    %80 = vector.broadcast %79 : f32 to vector<2x1x2x128xf32>
    %81 = arith.select %60, %80, %58 : vector<2x1x2x128xi1>, vector<2x1x2x128xf32>
    %cst_18 = arith.constant 3.000000e+00 : f32
    %82 = vector.broadcast %cst_18 : f32 to vector<2x1x2x128xf32>
    %83 = arith.cmpf oge, %15, %82 : vector<2x1x2x128xf32>
    %c12_i32 = arith.constant 12 : i32
    %84 = arith.addi %19, %c12_i32 : i32
    %c0_i32_19 = arith.constant 0 : i32
    %85 = arith.addi %84, %c0_i32_19 : i32
    %86 = arith.index_cast %85 : i32 to index
    %87 = memref.load %arg3[%86] : memref<176xf32, #tpu.memory_space<smem>>
    %88 = vector.broadcast %87 : f32 to vector<2x1x2x128xf32>
    %89 = arith.select %83, %88, %66 : vector<2x1x2x128xi1>, vector<2x1x2x128xf32>
    %c1_i32_20 = arith.constant 1 : i32
    %90 = arith.addi %84, %c1_i32_20 : i32
    %91 = arith.index_cast %90 : i32 to index
    %92 = memref.load %arg3[%91] : memref<176xf32, #tpu.memory_space<smem>>
    %93 = vector.broadcast %92 : f32 to vector<2x1x2x128xf32>
    %94 = arith.select %83, %93, %71 : vector<2x1x2x128xi1>, vector<2x1x2x128xf32>
    %c2_i32_21 = arith.constant 2 : i32
    %95 = arith.addi %84, %c2_i32_21 : i32
    %96 = arith.index_cast %95 : i32 to index
    %97 = memref.load %arg3[%96] : memref<176xf32, #tpu.memory_space<smem>>
    %98 = vector.broadcast %97 : f32 to vector<2x1x2x128xf32>
    %99 = arith.select %83, %98, %76 : vector<2x1x2x128xi1>, vector<2x1x2x128xf32>
    %c3_i32_22 = arith.constant 3 : i32
    %100 = arith.addi %84, %c3_i32_22 : i32
    %101 = arith.index_cast %100 : i32 to index
    %102 = memref.load %arg3[%101] : memref<176xf32, #tpu.memory_space<smem>>
    %103 = vector.broadcast %102 : f32 to vector<2x1x2x128xf32>
    %104 = arith.select %83, %103, %81 : vector<2x1x2x128xi1>, vector<2x1x2x128xf32>
    %cst_23 = arith.constant 4.000000e+00 : f32
    %105 = vector.broadcast %cst_23 : f32 to vector<2x1x2x128xf32>
    %106 = arith.cmpf oge, %15, %105 : vector<2x1x2x128xf32>
    %c16_i32 = arith.constant 16 : i32
    %107 = arith.addi %19, %c16_i32 : i32
    %c0_i32_24 = arith.constant 0 : i32
    %108 = arith.addi %107, %c0_i32_24 : i32
    %109 = arith.index_cast %108 : i32 to index
    %110 = memref.load %arg3[%109] : memref<176xf32, #tpu.memory_space<smem>>
    %111 = vector.broadcast %110 : f32 to vector<2x1x2x128xf32>
    %112 = arith.select %106, %111, %89 : vector<2x1x2x128xi1>, vector<2x1x2x128xf32>
    %c1_i32_25 = arith.constant 1 : i32
    %113 = arith.addi %107, %c1_i32_25 : i32
    %114 = arith.index_cast %113 : i32 to index
    %115 = memref.load %arg3[%114] : memref<176xf32, #tpu.memory_space<smem>>
    %116 = vector.broadcast %115 : f32 to vector<2x1x2x128xf32>
    %117 = arith.select %106, %116, %94 : vector<2x1x2x128xi1>, vector<2x1x2x128xf32>
    %c2_i32_26 = arith.constant 2 : i32
    %118 = arith.addi %107, %c2_i32_26 : i32
    %119 = arith.index_cast %118 : i32 to index
    %120 = memref.load %arg3[%119] : memref<176xf32, #tpu.memory_space<smem>>
    %121 = vector.broadcast %120 : f32 to vector<2x1x2x128xf32>
    %122 = arith.select %106, %121, %99 : vector<2x1x2x128xi1>, vector<2x1x2x128xf32>
    %c3_i32_27 = arith.constant 3 : i32
    %123 = arith.addi %107, %c3_i32_27 : i32
    %124 = arith.index_cast %123 : i32 to index
    %125 = memref.load %arg3[%124] : memref<176xf32, #tpu.memory_space<smem>>
    %126 = vector.broadcast %125 : f32 to vector<2x1x2x128xf32>
    %127 = arith.select %106, %126, %104 : vector<2x1x2x128xi1>, vector<2x1x2x128xf32>
    %cst_28 = arith.constant 5.000000e+00 : f32
    %128 = vector.broadcast %cst_28 : f32 to vector<2x1x2x128xf32>
    %129 = arith.cmpf oge, %15, %128 : vector<2x1x2x128xf32>
    %c20_i32 = arith.constant 20 : i32
    %130 = arith.addi %19, %c20_i32 : i32
    %c0_i32_29 = arith.constant 0 : i32
    %131 = arith.addi %130, %c0_i32_29 : i32
    %132 = arith.index_cast %131 : i32 to index
    %133 = memref.load %arg3[%132] : memref<176xf32, #tpu.memory_space<smem>>
    %134 = vector.broadcast %133 : f32 to vector<2x1x2x128xf32>
    %135 = arith.select %129, %134, %112 : vector<2x1x2x128xi1>, vector<2x1x2x128xf32>
    %c1_i32_30 = arith.constant 1 : i32
    %136 = arith.addi %130, %c1_i32_30 : i32
    %137 = arith.index_cast %136 : i32 to index
    %138 = memref.load %arg3[%137] : memref<176xf32, #tpu.memory_space<smem>>
    %139 = vector.broadcast %138 : f32 to vector<2x1x2x128xf32>
    %140 = arith.select %129, %139, %117 : vector<2x1x2x128xi1>, vector<2x1x2x128xf32>
    %c2_i32_31 = arith.constant 2 : i32
    %141 = arith.addi %130, %c2_i32_31 : i32
    %142 = arith.index_cast %141 : i32 to index
    %143 = memref.load %arg3[%142] : memref<176xf32, #tpu.memory_space<smem>>
    %144 = vector.broadcast %143 : f32 to vector<2x1x2x128xf32>
    %145 = arith.select %129, %144, %122 : vector<2x1x2x128xi1>, vector<2x1x2x128xf32>
    %c3_i32_32 = arith.constant 3 : i32
    %146 = arith.addi %130, %c3_i32_32 : i32
    %147 = arith.index_cast %146 : i32 to index
    %148 = memref.load %arg3[%147] : memref<176xf32, #tpu.memory_space<smem>>
    %149 = vector.broadcast %148 : f32 to vector<2x1x2x128xf32>
    %150 = arith.select %129, %149, %127 : vector<2x1x2x128xi1>, vector<2x1x2x128xf32>
    %cst_33 = arith.constant 6.000000e+00 : f32
    %151 = vector.broadcast %cst_33 : f32 to vector<2x1x2x128xf32>
    %152 = arith.cmpf oge, %15, %151 : vector<2x1x2x128xf32>
    %c24_i32 = arith.constant 24 : i32
    %153 = arith.addi %19, %c24_i32 : i32
    %c0_i32_34 = arith.constant 0 : i32
    %154 = arith.addi %153, %c0_i32_34 : i32
    %155 = arith.index_cast %154 : i32 to index
    %156 = memref.load %arg3[%155] : memref<176xf32, #tpu.memory_space<smem>>
    %157 = vector.broadcast %156 : f32 to vector<2x1x2x128xf32>
    %158 = arith.select %152, %157, %135 : vector<2x1x2x128xi1>, vector<2x1x2x128xf32>
    %c1_i32_35 = arith.constant 1 : i32
    %159 = arith.addi %153, %c1_i32_35 : i32
    %160 = arith.index_cast %159 : i32 to index
    %161 = memref.load %arg3[%160] : memref<176xf32, #tpu.memory_space<smem>>
    %162 = vector.broadcast %161 : f32 to vector<2x1x2x128xf32>
    %163 = arith.select %152, %162, %140 : vector<2x1x2x128xi1>, vector<2x1x2x128xf32>
    %c2_i32_36 = arith.constant 2 : i32
    %164 = arith.addi %153, %c2_i32_36 : i32
    %165 = arith.index_cast %164 : i32 to index
    %166 = memref.load %arg3[%165] : memref<176xf32, #tpu.memory_space<smem>>
    %167 = vector.broadcast %166 : f32 to vector<2x1x2x128xf32>
    %168 = arith.select %152, %167, %145 : vector<2x1x2x128xi1>, vector<2x1x2x128xf32>
    %c3_i32_37 = arith.constant 3 : i32
    %169 = arith.addi %153, %c3_i32_37 : i32
    %170 = arith.index_cast %169 : i32 to index
    %171 = memref.load %arg3[%170] : memref<176xf32, #tpu.memory_space<smem>>
    %172 = vector.broadcast %171 : f32 to vector<2x1x2x128xf32>
    %173 = arith.select %152, %172, %150 : vector<2x1x2x128xi1>, vector<2x1x2x128xf32>
    %cst_38 = arith.constant 7.000000e+00 : f32
    %174 = vector.broadcast %cst_38 : f32 to vector<2x1x2x128xf32>
    %175 = arith.cmpf oge, %15, %174 : vector<2x1x2x128xf32>
    %c28_i32 = arith.constant 28 : i32
    %176 = arith.addi %19, %c28_i32 : i32
    %c0_i32_39 = arith.constant 0 : i32
    %177 = arith.addi %176, %c0_i32_39 : i32
    %178 = arith.index_cast %177 : i32 to index
    %179 = memref.load %arg3[%178] : memref<176xf32, #tpu.memory_space<smem>>
    %180 = vector.broadcast %179 : f32 to vector<2x1x2x128xf32>
    %181 = arith.select %175, %180, %158 : vector<2x1x2x128xi1>, vector<2x1x2x128xf32>
    %c1_i32_40 = arith.constant 1 : i32
    %182 = arith.addi %176, %c1_i32_40 : i32
    %183 = arith.index_cast %182 : i32 to index
    %184 = memref.load %arg3[%183] : memref<176xf32, #tpu.memory_space<smem>>
    %185 = vector.broadcast %184 : f32 to vector<2x1x2x128xf32>
    %186 = arith.select %175, %185, %163 : vector<2x1x2x128xi1>, vector<2x1x2x128xf32>
    %c2_i32_41 = arith.constant 2 : i32
    %187 = arith.addi %176, %c2_i32_41 : i32
    %188 = arith.index_cast %187 : i32 to index
    %189 = memref.load %arg3[%188] : memref<176xf32, #tpu.memory_space<smem>>
    %190 = vector.broadcast %189 : f32 to vector<2x1x2x128xf32>
    %191 = arith.select %175, %190, %168 : vector<2x1x2x128xi1>, vector<2x1x2x128xf32>
    %c3_i32_42 = arith.constant 3 : i32
    %192 = arith.addi %176, %c3_i32_42 : i32
    %193 = arith.index_cast %192 : i32 to index
    %194 = memref.load %arg3[%193] : memref<176xf32, #tpu.memory_space<smem>>
    %195 = vector.broadcast %194 : f32 to vector<2x1x2x128xf32>
    %196 = arith.select %175, %195, %173 : vector<2x1x2x128xi1>, vector<2x1x2x128xf32>
    %cst_43 = arith.constant 8.000000e+00 : f32
    %197 = vector.broadcast %cst_43 : f32 to vector<2x1x2x128xf32>
    %198 = arith.cmpf oge, %15, %197 : vector<2x1x2x128xf32>
    %c32_i32 = arith.constant 32 : i32
    %199 = arith.addi %19, %c32_i32 : i32
    %c0_i32_44 = arith.constant 0 : i32
    %200 = arith.addi %199, %c0_i32_44 : i32
    %201 = arith.index_cast %200 : i32 to index
    %202 = memref.load %arg3[%201] : memref<176xf32, #tpu.memory_space<smem>>
    %203 = vector.broadcast %202 : f32 to vector<2x1x2x128xf32>
    %204 = arith.select %198, %203, %181 : vector<2x1x2x128xi1>, vector<2x1x2x128xf32>
    %c1_i32_45 = arith.constant 1 : i32
    %205 = arith.addi %199, %c1_i32_45 : i32
    %206 = arith.index_cast %205 : i32 to index
    %207 = memref.load %arg3[%206] : memref<176xf32, #tpu.memory_space<smem>>
    %208 = vector.broadcast %207 : f32 to vector<2x1x2x128xf32>
    %209 = arith.select %198, %208, %186 : vector<2x1x2x128xi1>, vector<2x1x2x128xf32>
    %c2_i32_46 = arith.constant 2 : i32
    %210 = arith.addi %199, %c2_i32_46 : i32
    %211 = arith.index_cast %210 : i32 to index
    %212 = memref.load %arg3[%211] : memref<176xf32, #tpu.memory_space<smem>>
    %213 = vector.broadcast %212 : f32 to vector<2x1x2x128xf32>
    %214 = arith.select %198, %213, %191 : vector<2x1x2x128xi1>, vector<2x1x2x128xf32>
    %c3_i32_47 = arith.constant 3 : i32
    %215 = arith.addi %199, %c3_i32_47 : i32
    %216 = arith.index_cast %215 : i32 to index
    %217 = memref.load %arg3[%216] : memref<176xf32, #tpu.memory_space<smem>>
    %218 = vector.broadcast %217 : f32 to vector<2x1x2x128xf32>
    %219 = arith.select %198, %218, %196 : vector<2x1x2x128xi1>, vector<2x1x2x128xf32>
    %cst_48 = arith.constant 9.000000e+00 : f32
    %220 = vector.broadcast %cst_48 : f32 to vector<2x1x2x128xf32>
    %221 = arith.cmpf oge, %15, %220 : vector<2x1x2x128xf32>
    %c36_i32 = arith.constant 36 : i32
    %222 = arith.addi %19, %c36_i32 : i32
    %c0_i32_49 = arith.constant 0 : i32
    %223 = arith.addi %222, %c0_i32_49 : i32
    %224 = arith.index_cast %223 : i32 to index
    %225 = memref.load %arg3[%224] : memref<176xf32, #tpu.memory_space<smem>>
    %226 = vector.broadcast %225 : f32 to vector<2x1x2x128xf32>
    %227 = arith.select %221, %226, %204 : vector<2x1x2x128xi1>, vector<2x1x2x128xf32>
    %c1_i32_50 = arith.constant 1 : i32
    %228 = arith.addi %222, %c1_i32_50 : i32
    %229 = arith.index_cast %228 : i32 to index
    %230 = memref.load %arg3[%229] : memref<176xf32, #tpu.memory_space<smem>>
    %231 = vector.broadcast %230 : f32 to vector<2x1x2x128xf32>
    %232 = arith.select %221, %231, %209 : vector<2x1x2x128xi1>, vector<2x1x2x128xf32>
    %c2_i32_51 = arith.constant 2 : i32
    %233 = arith.addi %222, %c2_i32_51 : i32
    %234 = arith.index_cast %233 : i32 to index
    %235 = memref.load %arg3[%234] : memref<176xf32, #tpu.memory_space<smem>>
    %236 = vector.broadcast %235 : f32 to vector<2x1x2x128xf32>
    %237 = arith.select %221, %236, %214 : vector<2x1x2x128xi1>, vector<2x1x2x128xf32>
    %c3_i32_52 = arith.constant 3 : i32
    %238 = arith.addi %222, %c3_i32_52 : i32
    %239 = arith.index_cast %238 : i32 to index
    %240 = memref.load %arg3[%239] : memref<176xf32, #tpu.memory_space<smem>>
    %241 = vector.broadcast %240 : f32 to vector<2x1x2x128xf32>
    %242 = arith.select %221, %241, %219 : vector<2x1x2x128xi1>, vector<2x1x2x128xf32>
    %cst_53 = arith.constant 1.000000e+01 : f32
    %243 = vector.broadcast %cst_53 : f32 to vector<2x1x2x128xf32>
    %244 = arith.cmpf oge, %15, %243 : vector<2x1x2x128xf32>
    %c40_i32 = arith.constant 40 : i32
    %245 = arith.addi %19, %c40_i32 : i32
    %c0_i32_54 = arith.constant 0 : i32
    %246 = arith.addi %245, %c0_i32_54 : i32
    %247 = arith.index_cast %246 : i32 to index
    %248 = memref.load %arg3[%247] : memref<176xf32, #tpu.memory_space<smem>>
    %249 = vector.broadcast %248 : f32 to vector<2x1x2x128xf32>
    %250 = arith.select %244, %249, %227 : vector<2x1x2x128xi1>, vector<2x1x2x128xf32>
    %c1_i32_55 = arith.constant 1 : i32
    %251 = arith.addi %245, %c1_i32_55 : i32
    %252 = arith.index_cast %251 : i32 to index
    %253 = memref.load %arg3[%252] : memref<176xf32, #tpu.memory_space<smem>>
    %254 = vector.broadcast %253 : f32 to vector<2x1x2x128xf32>
    %255 = arith.select %244, %254, %232 : vector<2x1x2x128xi1>, vector<2x1x2x128xf32>
    %c2_i32_56 = arith.constant 2 : i32
    %256 = arith.addi %245, %c2_i32_56 : i32
    %257 = arith.index_cast %256 : i32 to index
    %258 = memref.load %arg3[%257] : memref<176xf32, #tpu.memory_space<smem>>
    %259 = vector.broadcast %258 : f32 to vector<2x1x2x128xf32>
    %260 = arith.select %244, %259, %237 : vector<2x1x2x128xi1>, vector<2x1x2x128xf32>
    %c3_i32_57 = arith.constant 3 : i32
    %261 = arith.addi %245, %c3_i32_57 : i32
    %262 = arith.index_cast %261 : i32 to index
    %263 = memref.load %arg3[%262] : memref<176xf32, #tpu.memory_space<smem>>
    %264 = vector.broadcast %263 : f32 to vector<2x1x2x128xf32>
    %265 = arith.select %244, %264, %242 : vector<2x1x2x128xi1>, vector<2x1x2x128xf32>
    %266 = arith.mulf %18, %265 : vector<2x1x2x128xf32>
    %267 = arith.addf %260, %266 : vector<2x1x2x128xf32>
    %268 = arith.mulf %18, %267 : vector<2x1x2x128xf32>
    %269 = arith.addf %255, %268 : vector<2x1x2x128xf32>
    %270 = arith.mulf %18, %269 : vector<2x1x2x128xf32>
    %271 = arith.addf %250, %270 : vector<2x1x2x128xf32>
    %cst_58 = arith.constant -2.200000e+00 : f32
    %272 = vector.broadcast %cst_58 : f32 to vector<2x1x2x128xf32>
    %273 = arith.cmpf oge, %0, %272 : vector<2x1x2x128xf32>
    %cst_59 = arith.constant 2.200000e+00 : f32
    %274 = vector.broadcast %cst_59 : f32 to vector<2x1x2x128xf32>
    %275 = arith.cmpf olt, %0, %274 : vector<2x1x2x128xf32>
    %276 = arith.andi %273, %275 : vector<2x1x2x128xi1>
    %cst_60 = arith.constant 0.000000e+00 : f32
    %277 = vector.broadcast %cst_60 : f32 to vector<2x1x2x128xf32>
    %278 = arith.select %276, %271, %277 : vector<2x1x2x128xi1>, vector<2x1x2x128xf32>
    %c2_i32_61 = arith.constant 2 : i32
    %279 = arith.muli %c2_i32_61, %arg1 : i32
    %280 = arith.index_cast %279 : i32 to index
    %281 = memref.load %arg4[%280] : memref<8xf32, #tpu.memory_space<smem>>
    %282 = vector.broadcast %281 : f32 to vector<2x1x2x128xf32>
    %283 = arith.mulf %282, %6 : vector<2x1x2x128xf32>
    %284 = arith.addf %283, %278 : vector<2x1x2x128xf32>
    %c2_i32_62 = arith.constant 2 : i32
    %285 = arith.muli %c2_i32_62, %arg1 : i32
    %c1_i32_63 = arith.constant 1 : i32
    %286 = arith.addi %285, %c1_i32_63 : i32
    %287 = arith.index_cast %286 : i32 to index
    %288 = memref.load %arg4[%287] : memref<8xf32, #tpu.memory_space<smem>>
    %289 = vector.broadcast %288 : f32 to vector<2x1x2x128xf32>
    %290 = arith.addf %284, %289 : vector<2x1x2x128xf32>
    %c0_64 = arith.constant 0 : index
    %c0_65 = arith.constant 0 : index
    %c0_66 = arith.constant 0 : index
    %c0_67 = arith.constant 0 : index
    %291 = vector.load %arg6[%c0_64, %c0_65, %c0_66, %c0_67] : memref<2x1x2x128xf32, #tpu.memory_space<vmem>>, vector<2x1x2x128xf32>
    tpu.vector_store %arg6[%c0_64, %c0_65, %c0_66, %c0_67], %290 {strides = array<i32>} : memref<2x1x2x128xf32, #tpu.memory_space<vmem>>, vector<2x1x2x128xf32>,
    return
  }
  func.func @transform_0(%arg0: i32, %arg1: i32, %arg2: i32) -> i32 {
    %c0_i32 = arith.constant 0 : i32
    %c0_i32_0 = arith.constant 0 : i32
    return %c0_i32 : i32
  }
  func.func @transform_1(%arg0: i32, %arg1: i32, %arg2: i32) -> i32 {
    %c0_i32 = arith.constant 0 : i32
    %c0_i32_0 = arith.constant 0 : i32
    return %c0_i32 : i32
  }
  func.func @transform_2(%arg0: i32, %arg1: i32, %arg2: i32) -> (i32, i32, i32, i32) {
    %c0_i32 = arith.constant 0 : i32
    %c0_i32_0 = arith.constant 0 : i32
    return %arg0, %arg1, %arg2, %c0_i32 : i32, i32, i32, i32
  }
  func.func @transform_3(%arg0: i32, %arg1: i32, %arg2: i32) -> (i32, i32, i32, i32) {
    %c0_i32 = arith.constant 0 : i32
    %c0_i32_0 = arith.constant 0 : i32
    return %arg0, %arg1, %arg2, %c0_i32 : i32, i32, i32, i32
  }
}

</mosaic_0001>

<bundles_post_ra>
// kernel: kan_activation.1
= control target key start
LH: loop header
LB: loop body
LE: loop exit
PB: predicated region body
PF: predicated region fallthrough
CT: control target
= control target key end

     0   :  { %8 = vsyncpa [#allocation3], 0  ;;  %s1518_s0 = inlined_call_operand.vmem [shape: f32[176], index: 0, kind: input, shape index: {}]   ;;  %s1519_s1 = inlined_call_operand.vmem [shape: f32[8], index: 1, kind: input, shape index: {}]   ;;  %s1520_s2 = inlined_call_operand.vmem [shape: f32[2,4,2,128], index: 2, kind: input, shape index: {}]   ;;  %s1521_s3 = inlined_call_operand.vmem [shape: f32[2,4,2,128], index: 3, kind: output, shape index: {}]  }
   0x1   :  { %9 = vsyncpa [#allocation5], 0  ;;  %s923_s12 = smov 0   ;;  %s925_s13 = smov 0  }
   0x2   :  { %s927_s14 = smov 0   ;;  %s929_s15 = smov 0  }
   0x3   :  { %s931_s16 = smov 0  }
   0x4 LB: > { %s732_s17 = sadd.s32 4294967295, %s899_s16   ;;  %s30_s18 = sadd.s32 1, %s895_s15  ;;  %s899_s16 = sphi %s931_s16, %s15_s16   ;;  %s895_s15 = sphi %s929_s15, %s1537_s15   ;;  %s891_s14 = sphi %s927_s14, %s1536_s14   ;;  %s887_s13 = sphi %s925_s13, %s1535_s13   ;;  %s883_s12 = sphi %s923_s12, %s1534_s12  }
   0x5   : > { %p32_p0 = scmp.ge.s32.totalorder %s30_s18, 4  ;;  %s87_s19 = sadd.s32 1, %s887_s13 }
   0x6   : > { %p94_p1 = scmp.ne.s32.totalorder %s887_s13, %s883_s12  ;;  %p95_p2 = scmp.eq.s32.totalorder %s899_s16, 0 }
   0x7   : > { %s1539_s18 = smov (%p32_p0, %s30_s18), 0  ;;  %p128_p4 = scmp.eq.s32.totalorder %s732_s17, 3 }
   0x8   : > { %p956_p3 = por %p95_p2, %p94_p1  ;;  %s81_s21 = ssub.s32 %s895_s15, %s1539_s18 }
   0x9   : > { %p734_p5 = scmp.ge.s32.totalorder %s899_s16, 1  ;;  %p85_p6 = scmp.eq.s32.totalorder %s81_s21, 0 }
   0xa   : > { %p963_p7 = por %p128_p4, %p94_p1  ;;  %p141_p8 = scmp.lt.s32.totalorder %s899_s16, 5 }
   0xb   : > { %s969_s23 = scalar_select %p85_p6, %s887_s13, %s87_s19  }
   0xc   : > { %p971_p9 = pnand %p734_p5, %p141_p8  ;;  %p975_p10 = scmp.eq.s32.totalorder %s732_s17, 0 }
   0xd   : > { %s153_s28 = sshll.u32 %s1518_s0, 4  ;;  %s163_s4 = sshll.u32 %s1519_s1, 4  ;;  %s154_s28 = int_to_ptr.vmem [resolvable:$true] %s153_s28  ;;  %s164_s4 = int_to_ptr.vmem [resolvable:$true] %s163_s4 }
   0xe   : > { %p762_p11 = pneg %p971_p9  ;;  %s901_s5 = smov [#allocation2]  }
   0xf   : > { %s902_s6 = smov [#allocation4]   ;;  %p737_p13 = scmp.ge.s32.totalorder %s899_s16, 4 }
  0x10   : > { %p763_p12 = pnand %p975_p10, %p762_p11 }
  0x11   : > { %170 = sbr.rel (%p737_p13) target bundleno = 28 (0x1c), region = 24 }
  0x12   : > { %765 = dma.vmem_to_smem (!%p763_p12), %s154_s28, 32, %s901_s5, [#allocation3]  }
  0x13   : > { %768 = dma.vmem_to_smem (!%p763_p12), %s164_s4, 16, %s902_s6, [#allocation5]  }
  0x16   : > { %173 = sbr.rel (!%p956_p3) target bundleno = 28 (0x1c), region = 28  ;;  %s175_s7 = sand.u32 (%p956_p3), 1, %s887_s13  }
  0x17   : > { %s739_s8 = sshll.u32 (%p956_p3), %s895_s15, 1  ;;  %s738_s9 = sshll.u32 (%p956_p3), %s175_s7, 2 }
  0x18   : > { %s183_s17 = scalar_lea.vmem (%p956_p3), %s1520_s2, %s739_s8  ;;  %s177_s19 = scalar_lea.vmem (%p956_p3), [#allocation6], %s738_s9 }
  0x19   : > { %v200_v0 = vld [vmem:[%s183_s17] sm:$0x3] (%p956_p3)  ;;  %v202_v1 = vld [vmem:[%s183_s17 + $0x8] sm:$0x3] (%p956_p3) }
  0x1a   : > { %201 = vst [vmem:[%s177_s19] sm:$0x3] (%p956_p3), %v200_v0 }
  0x1b   : > { %203 = vst [vmem:[%s177_s19 + $0x2] sm:$0x3] %v202_v1 }
  0x1c PF: > { %226 = sbr.rel (%p971_p9) target bundleno = 119 (0x77), region = 62 }
  0x21   : > { %874 = dma.done.wait (%p975_p10), [#allocation3], 32  }
  0x22   : > { %876 = vsyncadd (%p975_p10), [#allocation3], 4294967264 }
  0x23   : > { %878 = dma.done.wait (%p975_p10), [#allocation5], 16  }
  0x24   : > { %880 = vsyncadd (%p975_p10), [#allocation5], 4294967280  ;;  %s239_s20 = sand.u32 1, %s883_s12  }
  0x25   : > { %s1008_s21 = sshll.u32 %s239_s20, 2 }
  0x26   : > { %s241_s26 = scalar_lea.vmem [#allocation6], %s1008_s21 }
  0x27   : > { %245 = sfence }
  0x28   : > { %v1011_v2 = vld [vmem:[%s241_s26] sm:$0x3]  ;;  %v1013_v3 = vld [vmem:[%s241_s26 + $0x2] sm:$0x3]  ;;  %s1016_s24 = smul.u32 44, %s891_s14 }
  0x29   : > { %v745_v4 = vmul.f32 -1.442695, %v1011_v2  ;;  %v746_v5 = vmul.f32 -1.442695, %v1013_v3  ;;  %v747_v6 = vadd.f32 2.2, %v1011_v2 }
  0x2a   : > { %v748_v7 = vadd.f32 2.2, %v1013_v3  ;;  %s1023_s12 = sld [smem:[#allocation2 + %s1016_s24]]  ;;  %s322_s25 = sadd.s32 1, %s1016_s24 }
  0x2b   : > { %815 = vpow2.f32 %v745_v4  ;;  %v1026_v8 = vmul.f32 2.5, %v747_v6  ;;  %s1028_s27 = sld [smem:[#allocation2 + %s322_s25]]  ;;  %s324_s28 = sadd.s32 2, %s1016_s24 }
  0x2c   : > { %817 = vpow2.f32 %v746_v5  ;;  %v1031_v9 = vmul.f32 2.5, %v748_v7  ;;  %s1033_s29 = sld [smem:[#allocation2 + %s324_s28]]  ;;  %s326_s30 = sadd.s32 3, %s1016_s24 }
  0x2d   : > { %v310_v10 = vfloor.f32 %v1026_v8  ;;  %s1037_s4 = sld [smem:[#allocation2 + %s326_s30]]  ;;  %s330_s5 = sadd.s32 4, %s1016_s24 }
  0x2e   : > { %s1040_s6 = sld [smem:[#allocation2 + %s330_s5]]  ;;  %s336_s7 = sadd.s32 5, %s1016_s24  ;;  %v311_v11 = vfloor.f32 %v1031_v9 }
  0x2f   : > { %s1043_s8 = sld [smem:[#allocation2 + %s336_s7]]  ;;  %s342_s9 = sadd.s32 6, %s1016_s24  ;;  %v312_v13 = vmax.f32 %v310_v10, 0.0 }
  0x30   : > { %s1047_s10 = sld [smem:[#allocation2 + %s342_s9]]  ;;  %s348_s11 = sadd.s32 7, %s1016_s24  ;;  %v313_v17 = vmax.f32 %v311_v11, 0.0  ;;  %v333_v20 = vstv %s1023_s12 }
  0x31   : > { %v816_v12 = vpop.eup %815  ;;  %s1050_s17 = sld [smem:[#allocation2 + %s348_s11]]  ;;  %s356_s19 = sadd.s32 8, %s1016_s24  ;;  %v1068_v18 = vmin.f32 %v312_v13, 10.0  ;;  %v339_v24 = vstv %s1028_s27 }
  0x32   : > { %v818_v14 = vpop.eup %817  ;;  %v1053_v15 = vadd.f32 1.0, %v816_v12  ;;  %s1055_s20 = sld [smem:[#allocation2 + %s356_s19]]  ;;  %s361_s26 = sadd.s32 9, %s1016_s24  ;;  %v1082_v22 = vmin.f32 %v313_v17, 10.0  ;;  %v345_v26 = vstv %s1033_s29 }
  0x33   : > { %v1058_v16 = vadd.f32 1.0, %v818_v14  ;;  %s1060_s25 = sld [smem:[#allocation2 + %s361_s26]]  ;;  %s366_s28 = sadd.s32 10, %s1016_s24  ;;  %v316_v23 = vsub.f32 %v1026_v8, %v1068_v18  ;;  %vm328_vm0 = vcmp.ge.f32.partialorder %v1068_v18, 1.0  ;;  %v351_v27 = vstv %s1037_s4 }
  0x34   : > { %819 = vrcp.f32 %v1053_v15  ;;  %s1064_s30 = sld [smem:[#allocation2 + %s366_s28]]  ;;  %s371_s5 = sadd.s32 11, %s1016_s24  ;;  %v285_v19 = vand.u32 2147483648, %v1053_v15  ;;  %v283_v25 = vand.u32 2147483647, %v1053_v15  ;;  %vm279_vm1 = vweird.f32 %v1053_v15 }
  0x35   : > { %821 = vrcp.f32 %v1058_v16  ;;  %s1070_s7 = sld [smem:[#allocation2 + %s371_s5]]  ;;  %s378_s9 = sadd.s32 12, %s1016_s24  ;;  %v300_v21 = vand.u32 2147483648, %v1058_v16  ;;  %v298_v30 = vand.u32 2147483647, %v1058_v16  ;;  %v332_v31 = vstv %s1040_s6 }
  0x36   : > { %s1074_s11 = sld [smem:[#allocation2 + %s378_s9]]  ;;  %s383_s19 = sadd.s32 13, %s1016_s24  ;;  %v1100_v29 = vor.u32 1.1754944e-38, %v285_v19  ;;  %v317_v34 = vsub.f32 %v1031_v9, %v1082_v22  ;;  %v338_v35 = vstv %s1043_s8  ;;  %v344_v36 = vstv %s1047_s10 }
  0x37   : > { %s1078_s26 = sld [smem:[#allocation2 + %s383_s19]]  ;;  %s388_s28 = sadd.s32 14, %s1016_s24  ;;  %v1118_v37 = vor.u32 1.1754944e-38, %v300_v21  ;;  %v1120_v38 = vmul.f32 0.4, %v316_v23  ;;  %vm329_vm2 = vcmp.ge.f32.partialorder %v1082_v22, 1.0  ;;  %v350_v39 = vstv %s1050_s17 }
  0x38   : > { %s1087_s5 = sld [smem:[#allocation2 + %s388_s28]]  ;;  %s393_s9 = sadd.s32 15, %s1016_s24  ;;  %v334_v42 = vsel %vm328_vm0, %v332_v31, %v333_v20  ;;  %v335_v43 = vsel %vm329_vm2, %v332_v31, %v333_v20  ;;  %v340_v44 = vsel %vm328_vm0, %v338_v35, %v339_v24  ;;  %v341_v45 = vsel %vm329_vm2, %v338_v35, %v339_v24 }
  0x39   : > { %s1094_s12 = sld [smem:[#allocation2 + %s393_s9]]  ;;  %s400_s19 = sadd.s32 16, %s1016_s24  ;;  %v346_v46 = vsel %vm328_vm0, %v344_v36, %v345_v26  ;;  %v358_v47 = vstv %s1055_s20  ;;  %v347_v49 = vsel %vm329_vm2, %v344_v36, %v345_v26  ;;  %v352_v50 = vsel %vm328_vm0, %v350_v39, %v351_v27 }
  0x3a   : > { %v1097_v28 = vpop.eup %819  ;;  %s1104_s27 = sld [smem:[#allocation2 + %s400_s19]]  ;;  %s405_s28 = sadd.s32 17, %s1016_s24  ;;  %v363_v51 = vstv %s1060_s25  ;;  %v353_v52 = vsel %vm329_vm2, %v350_v39, %v351_v27  ;;  %vm354_vm4 = vcmp.ge.f32.partialorder %v1068_v18, 2.0  ;;  %v368_v53 = vstv %s1064_s30 }
  0x3b   : > { %v1107_v32 = vpop.eup %821  ;;  %v275_v33 = vmul.f32 %v1097_v28, %v1053_v15  ;;  %s1115_s29 = sld [smem:[#allocation2 + %s405_s28]]  ;;  %s410_s4 = sadd.s32 18, %s1016_s24  ;;  %vm280_vm3 = vweird.f32 %v1097_v28  ;;  %vm1163_vm5 = vcmp.eq.f32.partialorder %v283_v25, 8.507059e+37  ;;  %vm355_vm6 = vcmp.ge.f32.partialorder %v1082_v22, 2.0 }
  0x3c   : > { %s1124_s6 = sld [smem:[#allocation2 + %s410_s4]]  ;;  %s415_s9 = sadd.s32 19, %s1016_s24  ;;  %v290_v41 = vmul.f32 %v1107_v32, %v1058_v16  ;;  %v359_v56 = vsel %vm354_vm4, %v358_v47, %v334_v42  ;;  %v373_v57 = vstv %s1070_s7  ;;  %v360_v59 = vsel %vm355_vm6, %v358_v47, %v335_v43  ;;  %vm1189_vm7 = vmor %vm279_vm1, %vm280_vm3 }
  0x3d   : > { %v276_v40 = vsub.f32 1.0, %v275_v33  ;;  %s1133_s8 = sld [smem:[#allocation2 + %s415_s9]]  ;;  %s422_s10 = sadd.s32 20, %s1016_s24  ;;  %v364_v60 = vsel %vm354_vm4, %v363_v51, %v340_v44  ;;  %v380_v61 = vstv %s1074_s11  ;;  %v365_v63 = vsel %vm355_vm6, %v363_v51, %v341_v45 }
  0x3e   : > { %s1143_s17 = sld [smem:[#allocation2 + %s422_s10]]  ;;  %s427_s19 = sadd.s32 21, %s1016_s24  ;;  %v291_v55 = vsub.f32 1.0, %v290_v41  ;;  %v369_v0 = vsel %vm354_vm4, %v368_v53, %v346_v46  ;;  %v370_v1 = vsel %vm355_vm6, %v368_v53, %v347_v49  ;;  %v385_v4 = vstv %s1078_s26 }
  0x3f   : > { %v277_v48 = vmul.f32 %v1097_v28, %v276_v40  ;;  %s1152_s28 = sld [smem:[#allocation2 + %s427_s19]]  ;;  %s432_s4 = sadd.s32 22, %s1016_s24  ;;  %v374_v5 = vsel %vm354_vm4, %v373_v57, %v352_v50  ;;  %vm376_vm8 = vcmp.ge.f32.partialorder %v1068_v18, 3.0  ;;  %v390_v6 = vstv %s1087_s5 }
  0x40   : > { %s1160_s20 = sld [smem:[#allocation2 + %s432_s4]]  ;;  %s437_s9 = sadd.s32 23, %s1016_s24  ;;  %v395_v7 = vstv %s1094_s12  ;;  %v292_v8 = vmul.f32 %v1107_v32, %v291_v55  ;;  %v375_v10 = vsel %vm355_vm6, %v373_v57, %v353_v52  ;;  %vm377_vm9 = vcmp.ge.f32.partialorder %v1082_v22, 3.0 }
  0x41   : > { %s1171_s25 = sld [smem:[#allocation2 + %s437_s9]]  ;;  %s444_s10 = sadd.s32 24, %s1016_s24  ;;  %v1175_v58 = vadd.f32 %v1097_v28, %v277_v48  ;;  %v381_v11 = vsel %vm376_vm8, %v380_v61, %v359_v56  ;;  %v382_v13 = vsel %vm377_vm9, %v380_v61, %v360_v59  ;;  %v386_v14 = vsel %vm376_vm8, %v385_v4, %v364_v60 }
  0x42   : > { %s1182_s30 = sld [smem:[#allocation2 + %s444_s10]]  ;;  %s449_s19 = sadd.s32 25, %s1016_s24  ;;  %v402_v15 = vstv %s1104_s27  ;;  %v391_v17 = vsel %vm376_vm8, %v390_v6, %v369_v0  ;;  %v392_v19 = vsel %vm377_vm9, %v390_v6, %v370_v1  ;;  %v396_v20 = vsel %vm376_vm8, %v395_v7, %v374_v5 }
  0x43   : > { %s1200_s7 = sld [smem:[#allocation2 + %s449_s19]]  ;;  %s454_s11 = sadd.s32 26, %s1016_s24  ;;  %v282_v12 = vsel %vm1189_vm7, %v1097_v28, %v1175_v58  ;;  %vm398_vm10 = vcmp.ge.f32.partialorder %v1068_v18, 4.0  ;;  %v397_v21 = vsel %vm377_vm9, %v395_v7, %v375_v10  ;;  %vm399_vm11 = vcmp.ge.f32.partialorder %v1082_v22, 4.0 }
  0x44   : > { %s1208_s4 = sld [smem:[#allocation2 + %s454_s11]]  ;;  %s459_s9 = sadd.s32 27, %s1016_s24  ;;  %v412_v23 = vstv %s1124_s6  ;;  %v417_v24 = vstv %s1133_s8  ;;  %v387_v25 = vsel %vm377_vm9, %v385_v4, %v365_v63  ;;  %v403_v26 = vsel %vm398_vm10, %v402_v15, %v381_v11 }
  0x45   : > { %s1217_s26 = sld [smem:[#allocation2 + %s459_s9]]  ;;  %s466_s10 = sadd.s32 28, %s1016_s24  ;;  %v407_v27 = vstv %s1115_s29  ;;  %vm420_vm12 = vcmp.ge.f32.partialorder %v1068_v18, 5.0  ;;  %v413_v28 = vsel %vm398_vm10, %v412_v23, %v391_v17  ;;  %v414_v31 = vsel %vm399_vm11, %v412_v23, %v392_v19 }
  0x46   : > { %s1229_s5 = sld [smem:[#allocation2 + %s466_s10]]  ;;  %s471_s12 = sadd.s32 29, %s1016_s24  ;;  %vm421_vm13 = vcmp.ge.f32.partialorder %v1082_v22, 5.0  ;;  %v424_v33 = vstv %s1143_s17  ;;  %v418_v35 = vsel %vm398_vm10, %v417_v24, %v396_v20  ;;  %v419_v36 = vsel %vm399_vm11, %v417_v24, %v397_v21 }
  0x47   : > { %s1239_s19 = sld [smem:[#allocation2 + %s471_s12]]  ;;  %s476_s11 = sadd.s32 30, %s1016_s24  ;;  %v434_v39 = vstv %s1160_s20  ;;  %v439_v40 = vstv %s1171_s25  ;;  %v1280_v41 = vsel %vm1163_vm5, %v1100_v29, %v282_v12  ;;  %v1283_v42 = vadd.f32 %v1107_v32, %v292_v8 }
  0x48   : > { %s1247_s27 = sld [smem:[#allocation2 + %s476_s11]]  ;;  %s481_s9 = sadd.s32 31, %s1016_s24  ;;  %v1288_v43 = vmul.f32 0.4, %v317_v34  ;;  %v404_v44 = vsel %vm399_vm11, %v402_v15, %v382_v13  ;;  %v408_v45 = vsel %vm398_vm10, %v407_v27, %v386_v14  ;;  %v409_v29 = vsel %vm399_vm11, %v407_v27, %v387_v25 }
  0x49   : > { %s1256_s10 = sld [smem:[#allocation2 + %s481_s9]]  ;;  %s488_s12 = sadd.s32 32, %s1016_s24  ;;  %v425_v9 = vsel %vm420_vm12, %v424_v33, %v403_v26  ;;  %v429_v34 = vstv %s1152_s28  ;;  %vm294_vm14 = vweird.f32 %v1058_v16  ;;  %vm295_vm15 = vweird.f32 %v1107_v32 }
  0x4a   : > { %s1265_s6 = sld [smem:[#allocation2 + %s488_s12]]  ;;  %s493_s8 = sadd.s32 33, %s1016_s24  ;;  %v435_v46 = vsel %vm420_vm12, %v434_v39, %v413_v28  ;;  %v436_v47 = vsel %vm421_vm13, %v434_v39, %v414_v31  ;;  %v440_v48 = vsel %vm420_vm12, %v439_v40, %v418_v35  ;;  %v441_v49 = vsel %vm421_vm13, %v439_v40, %v419_v36  ;;  %vm1405_vm9 = vmor %vm294_vm14, %vm295_vm15 }
  0x4b   : > { %s1274_s29 = sld [smem:[#allocation2 + %s493_s8]]  ;;  %s498_s11 = sadd.s32 34, %s1016_s24  ;;  %vm442_vm0 = vcmp.ge.f32.partialorder %v1068_v18, 6.0  ;;  %vm443_vm1 = vcmp.ge.f32.partialorder %v1082_v22, 6.0  ;;  %v456_v50 = vstv %s1208_s4  ;;  %v461_v51 = vstv %s1217_s26 }
  0x4c   : > { %s1292_s17 = sld [smem:[#allocation2 + %s498_s11]]  ;;  %s503_s20 = sadd.s32 35, %s1016_s24  ;;  %v430_v52 = vsel %vm420_vm12, %v429_v34, %v408_v45  ;;  %v431_v53 = vsel %vm421_vm13, %v429_v34, %v409_v29  ;;  %v446_v54 = vstv %s1182_s30  ;;  %v451_v55 = vstv %s1200_s7 }
  0x4d   : > { %s1302_s25 = sld [smem:[#allocation2 + %s503_s20]]  ;;  %s510_s9 = sadd.s32 36, %s1016_s24  ;;  %v457_v56 = vsel %vm442_vm0, %v456_v50, %v435_v46  ;;  %v458_v57 = vsel %vm443_vm1, %v456_v50, %v436_v47  ;;  %vm464_vm2 = vcmp.ge.f32.partialorder %v1068_v18, 7.0  ;;  %v462_v59 = vsel %vm442_vm0, %v461_v51, %v440_v48 }
  0x4e   : > { %s1315_s28 = sld [smem:[#allocation2 + %s510_s9]]  ;;  %s515_s12 = sadd.s32 37, %s1016_s24  ;;  %v478_v58 = vstv %s1247_s27  ;;  %v463_v60 = vsel %vm443_vm1, %v461_v51, %v441_v49  ;;  %vm465_vm3 = vcmp.ge.f32.partialorder %v1082_v22, 7.0  ;;  %v426_v62 = vsel %vm421_vm13, %v424_v33, %v404_v44 }
  0x4f   : > { %s520_s8 = sadd.s32 38, %s1016_s24  ;;  %s525_s20 = sadd.s32 39, %s1016_s24  ;;  %v483_v61 = vstv %s1256_s10  ;;  %v447_v63 = vsel %vm442_vm0, %v446_v54, %v425_v9  ;;  %v452_v0 = vsel %vm442_vm0, %v451_v55, %v430_v52  ;;  %v473_v1 = vstv %s1239_s19 }
  0x50   : > { %s1329_s11 = sld [smem:[#allocation2 + %s520_s8]]  ;;  %s537_s7 = sadd.s32 41, %s1016_s24  ;;  %v453_v4 = vsel %vm443_vm1, %v451_v55, %v431_v53  ;;  %v468_v5 = vstv %s1229_s5  ;;  %v479_v6 = vsel %vm464_vm2, %v478_v58, %v457_v56  ;;  %v480_v7 = vsel %vm465_vm3, %v478_v58, %v458_v57 }
  0x51   : > { %s1338_s4 = sld [smem:[#allocation2 + %s525_s20]]  ;;  %s542_s26 = sadd.s32 42, %s1016_s24  ;;  %v484_v8 = vsel %vm464_vm2, %v483_v61, %v462_v59  ;;  %v485_v10 = vsel %vm465_vm3, %v483_v61, %v463_v60  ;;  %vm486_vm4 = vcmp.ge.f32.partialorder %v1068_v18, 8.0  ;;  %vm487_vm5 = vcmp.ge.f32.partialorder %v1082_v22, 8.0 }
  0x52   : > { %s1346_s30 = sld [smem:[#allocation2 + %s515_s12]]  ;;  %s547_s10 = sadd.s32 43, %s1016_s24  ;;  %vm1377_vm6 = vcmp.eq.f32.partialorder %v298_v30, 8.507059e+37  ;;  %v474_v12 = vsel %vm464_vm2, %v473_v1, %v452_v0  ;;  %v495_v13 = vstv %s1274_s29  ;;  %v500_v14 = vstv %s1292_s17 }
  0x53   : > { %s1364_s27 = sld [smem:[#allocation2 + %s542_s26]]  ;;  %v505_v15 = vstv %s1302_s25  ;;  %v501_v17 = vsel %vm486_vm4, %v500_v14, %v479_v6  ;;  %v502_v19 = vsel %vm487_vm5, %v500_v14, %v480_v7  ;;  %vm508_vm7 = vcmp.ge.f32.partialorder %v1068_v18, 9.0  ;;  %s532_s29 = sadd.s32 40, %s1016_s24 }
  0x54   : > { %s1373_s5 = sld [smem:[#allocation2 + %s547_s10]]  ;;  %vm509_vm8 = vcmp.ge.f32.partialorder %v1082_v22, 9.0  ;;  %v506_v30 = vsel %vm486_vm4, %v505_v15, %v484_v8  ;;  %v507_v20 = vsel %vm487_vm5, %v505_v15, %v485_v10  ;;  %v448_v25 = vsel %vm443_vm1, %v446_v54, %v426_v62  ;;  %s1424_s24 = sshll.u32 %s891_s14, 1 }
  0x55   : > { %s1392_s19 = sld [smem:[#allocation2 + %s537_s7]]  ;;  %v469_v26 = vsel %vm464_vm2, %v468_v5, %v447_v63  ;;  %v475_v27 = vsel %vm465_vm3, %v473_v1, %v453_v4  ;;  %v490_v28 = vstv %s1265_s6  ;;  %v496_v31 = vsel %vm486_vm4, %v495_v13, %v474_v12  ;;  %s579_s17 = sadd.s32 1, %s1424_s24 }
  0x56   : > { %v522_v21 = vstv %s1329_s11  ;;  %vm530_vm10 = vcmp.ge.f32.partialorder %v1068_v18, 10.0  ;;  %vm531_vm11 = vcmp.ge.f32.partialorder %v1082_v22, 10.0  ;;  %s1432_s6 = sld [smem:[#allocation2 + %s532_s29]]  ;;  %v297_v40 = vsel %vm1405_vm9, %v1107_v32, %v1283_v42  ;;  %s261_s9 = scalar_lea.vmem [#allocation7], %s1008_s21 }
  0x57   : > { %v527_v23 = vstv %s1338_s4  ;;  %v523_v33 = vsel %vm508_vm7, %v522_v21, %v501_v17  ;;  %v524_v35 = vsel %vm509_vm8, %v522_v21, %v502_v19  ;;  %v470_v44 = vsel %vm465_vm3, %v468_v5, %v448_v25  ;;  %s1450_s14 = sld [smem:[#allocation4 + %s1424_s24]]  ;;  %s598_s8 = scalar_lea.vmem (%p963_p7), %s1521_s3, %s1424_s24 }
  0x58   : > { %v517_v16 = vstv %s1346_s30  ;;  %v528_v36 = vsel %vm508_vm7, %v527_v23, %v506_v30  ;;  %v529_v39 = vsel %vm509_vm8, %v527_v23, %v507_v20  ;;  %v491_v45 = vsel %vm486_vm4, %v490_v28, %v469_v26  ;;  %s580_s25 = sld [smem:[#allocation4 + %s579_s17]] }
  0x59   : > { %v497_v29 = vsel %vm487_vm5, %v495_v13, %v475_v27  ;;  %v512_v9 = vstv %s1315_s28  ;;  %v518_v34 = vsel %vm508_vm7, %v517_v16, %v496_v31  ;;  %v544_v46 = vstv %s1364_s27 }
  0x5a   : > { %v549_v47 = vstv %s1373_s5  ;;  %v545_v32 = vsel %vm530_vm10, %v544_v46, %v523_v33  ;;  %v546_v42 = vsel %vm531_vm11, %v544_v46, %v524_v35  ;;  %v519_v50 = vsel %vm509_vm8, %v517_v16, %v497_v29 }
  0x5b   : > { %v550_v48 = vsel %vm530_vm10, %v549_v47, %v528_v36  ;;  %v551_v49 = vsel %vm531_vm11, %v549_v47, %v529_v39  ;;  %v539_v51 = vstv %s1392_s19  ;;  %v492_v54 = vsel %vm487_vm5, %v490_v28, %v470_v44 }
  0x5c   : > { %v552_v52 = vmul.f32 %v550_v48, %v1120_v38  ;;  %v553_v53 = vmul.f32 %v551_v49, %v1288_v43  ;;  %v302_v55 = vsel %vm1377_vm6, %v1118_v37, %v297_v40  ;;  %v304_v58 = vmul.f32 %v1280_v41, %v1011_v2 }
  0x5d   : > { %v513_v59 = vsel %vm508_vm7, %v512_v9, %v491_v45  ;;  %v540_v60 = vsel %vm530_vm10, %v539_v51, %v518_v34  ;;  %v541_v61 = vsel %vm531_vm11, %v539_v51, %v519_v50  ;;  %v514_v62 = vsel %vm509_vm8, %v512_v9, %v492_v54 }
  0x5e   : > { %v554_v56 = vadd.f32 %v552_v52, %v545_v32  ;;  %v555_v57 = vadd.f32 %v553_v53, %v546_v42  ;;  %v534_v63 = vstv %s1432_s6  ;;  %v305_v41 = vmul.f32 %v302_v55, %v1013_v3 }
  0x5f   : > { %vm564_vm12 = vcmp.ge.f32.partialorder %v1011_v2, -2.2  ;;  %vm565_vm13 = vcmp.ge.f32.partialorder %v1013_v3, -2.2  ;;  %vm566_vm14 = vcmp.lt.f32.partialorder %v1011_v2, 2.2  ;;  %v574_v5 = vstv %s1450_s14 }
  0x60   : > { %v556_v37 = vmul.f32 %v554_v56, %v1120_v38  ;;  %v557_v0 = vmul.f32 %v555_v57, %v1288_v43  ;;  %vm567_vm15 = vcmp.lt.f32.partialorder %v1013_v3, 2.2  ;;  %v535_v6 = vsel %vm530_vm10, %v534_v63, %v513_v59  ;;  %vm568_vm0 = vmand %vm564_vm12, %vm566_vm14 }
  0x61   : > { %v536_v7 = vsel %vm531_vm11, %v534_v63, %v514_v62  ;;  %vm569_vm1 = vmand %vm565_vm13, %vm567_vm15  ;;  %v575_v11 = vmul.f32 %v574_v5, %v304_v58  ;;  %v576_v2 = vmul.f32 %v574_v5, %v305_v41  ;;  %v581_v15 = vstv %s580_s25 }
  0x62   : > { %v558_v1 = vadd.f32 %v556_v37, %v540_v60  ;;  %v559_v4 = vadd.f32 %v557_v0, %v541_v61 }
  0x64   : > { %v560_v8 = vmul.f32 %v558_v1, %v1120_v38  ;;  %v561_v10 = vmul.f32 %v559_v4, %v1288_v43 }
  0x66   : > { %v562_v12 = vadd.f32 %v560_v8, %v535_v6  ;;  %v563_v13 = vadd.f32 %v561_v10, %v536_v7 }
  0x68   : > { %v570_v14 = vsel %vm568_vm0, %v562_v12, 0.0  ;;  %v571_v3 = vsel %vm569_vm1, %v563_v13, 0.0 }
  0x69   : > { %v577_v17 = vadd.f32 %v575_v11, %v570_v14  ;;  %v578_v18 = vadd.f32 %v576_v2, %v571_v3 }
  0x6a   : > { %592 = sbr.rel (!%p963_p7) target bundleno = 119 (0x77), region = 78 }
  0x6b   : > { %v582_v19 = vadd.f32 %v581_v15, %v577_v17  ;;  %v583_v30 = vadd.f32 %v581_v15, %v578_v18 }
  0x6d   : > { %584 = vst [vmem:[%s261_s9] sm:$0x3] %v582_v19 }
  0x6e   : > { %585 = vst [vmem:[%s261_s9 + $0x2] sm:$0x3] %v583_v30 }
  0x74   : > { %v615_v22 = vld [vmem:[%s261_s9] sm:$0x3] }
  0x75   : > { %v617_v38 = vld [vmem:[%s261_s9 + $0x2] sm:$0x3]  ;;  %616 = vst [vmem:[%s598_s8] sm:$0x3] %v615_v22 }
  0x76   : > { %618 = vst [vmem:[%s598_s8 + $0x8] sm:$0x3] %v617_v38 }
  0x77 PF: > { %s15_s16 = sadd.s32 1, %s899_s16   ;;  %s1534_s12 = smov %s887_s13 }
  0x78   : > { %p12_p0 = scmp.ge.s32.totalorder %s15_s16, 6   ;;  %s1535_s13 = smov %s969_s23 }
  0x79   : > { %s1536_s14 = smov %s895_s15  ;;  %s1537_s15 = smov %s1539_s18 }
  0x7a   :  { %14 = sbr.rel (!%p12_p0) target bundleno = 4 (0x4), region = 144 }
  0x7f   :  { %648 = vsyncpa [#allocation3], 1 }
  0x80   :  { %650 = vsyncpa [#allocation3 + $0x1], 1 }
  0x81   :  { %651 = vsyncpa [#allocation5], 1 }

</bundles_post_ra>
